<compile_context>
chip_gen: v6e
topology: v6e:2x2x1
jax: 0.10.0
libtpu: 0.0.40
codegen_flags: <defaults>
</compile_context>

<pallas_src>
import functools

import jax
import jax.numpy as jnp
from jax import lax
from jax.experimental import pallas as pl
from jax.experimental.pallas import tpu as pltpu


def _intra_view_loss_kernel(emb_ref, out_ref, *, n_views, n):
    """Single-invocation kernel: embeds fully VMEM-resident, pairs unrolled.

    emb_ref : (n_views, n, d) f32 VMEM -- the whole stacked embeddings.
    out_ref : (1, 128) f32 VMEM -- scalar loss broadcast across lanes
              (wrapper reads lane 0).
    """
    inv_n = jnp.float32(1.0 / n)
    total = jnp.float32(0.0)

    # Static unroll over unordered view pairs {i, j}, i <= j.  Each pair's
    # (n, n) logits tile serves BOTH ordered pairs: its row-wise LSE is the
    # (i, j) term and its column-wise LSE is the (j, i) term, so every MXU
    # matmul and every exp tile is computed exactly once.
    for i in range(n_views):
        ei = emb_ref[i]                                        # (n, d)
        for j in range(i, n_views):
            ej = emb_ref[j]                                    # (n, d)

            # logits[r, c] = <Ei[r], Ej[c]>; contract the last dims of both
            # operands (feeds the MXU directly, no transpose temporary).
            # TODO(synk): for matmul-bound shapes (large n, d >= ~128) cast
            # ei/ej to bfloat16 here (keep preferred_element_type=f32) for
            # ~3x MXU throughput on v6e/v7x.
            logits = lax.dot_general(
                ei, ej, (((1,), (1,)), ((), ())),
                preferred_element_type=jnp.float32)            # (n, n)

            # diag(Ei @ Ej^T)[r] = <Ei[r], Ej[r]> -- shared by both ordered
            # pairs; no (n, n) iota/select needed.
            diag_sum = jnp.sum(ei * ej)

            # Row-wise LSE.  The exp tile is computed ONCE and shared with
            # the column-wise LSE below (single EUP pass over n^2 elements).
            m_r = jnp.max(logits, axis=1, keepdims=True)       # (n, 1)
            e = jnp.exp(logits - m_r)                          # (n, n)
            # TODO(synk): for n >= ~512 with small d, do these sums as MXU
            # matvecs against a ones / weight vector to off-load the XLU.
            row_sum = jnp.sum(e, axis=1, keepdims=True)        # (n, 1)
            lse_r = jnp.log(row_sum) + m_r                     # (n, 1)
            total = total + (jnp.sum(lse_r) - diag_sum) * inv_n      # (i, j)

            if i != j:
                # Column-wise LSE of the SAME tile, from the shared exp tile
                # rescaled through the global max M:
                #   lse_c[c] = log(sum_r e[r, c] * exp(m_r[r] - M)) + M.
                # A row whose max is astronomically below M contributes ~0 to
                # the column sums -- acceptable for contrastive logits.
                m_g = jnp.max(m_r)                             # scalar
                w = jnp.exp(m_r - m_g)                         # (n, 1)
                col_sum = jnp.sum(e * w, axis=0, keepdims=True)  # (1, n)
                lse_c = jnp.log(col_sum) + m_g                 # (1, n)
                total = total + (jnp.sum(lse_c) - diag_sum) * inv_n  # (j, i)

    # Final normalization: matches the PyTorch divisor (incl. ~(j==i) quirk).
    loss = total * jnp.float32(1.0 / (n_views * (n_views - 1)))
    # Lane-dense unmasked store; wrapper reads element [0, 0].
    out_ref[...] = jnp.full(out_ref.shape, loss, dtype=jnp.float32)


def intra_view_contrastive_loss(embeds):
    """embeds: (n_views, n, d) float32 stacked view embeddings -> scalar loss."""
    n_views, n, d = embeds.shape

    # Budget the resident embeds slab + logits/exp temporaries against the
    # smallest default scoped VMEM (16 MiB on v5e); raise the limit only when
    # actually needed (review item: explicit vmem_limit_bytes once n grows).
    emb_bytes = n_views * n * d * 4
    tmp_bytes = 4 * n * n * 4            # logits + exp tile + slack
    need = emb_bytes + tmp_bytes + (1 << 20)
    compiler_params = None
    if need > (16 << 20):
        compiler_params = pltpu.CompilerParams(
            vmem_limit_bytes=min(2 * need, 100 << 20))

    kernel = functools.partial(_intra_view_loss_kernel, n_views=n_views, n=n)

    out = pl.pallas_call(
        kernel,
        out_shape=jax.ShapeDtypeStruct((1, 128), jnp.float32),
        # Whole arrays resident in VMEM; no grid, no per-pair re-DMA.
        in_specs=[pl.BlockSpec(memory_space=pltpu.MemorySpace.VMEM)],
        out_specs=pl.BlockSpec(memory_space=pltpu.MemorySpace.VMEM),
        compiler_params=compiler_params,
    )(embeds)
    return out[0, 0]


def _reference_loss(embeds):
    """Pure-JAX transcription of the PyTorch forward (incl. the ~(j==i) quirk)."""
    n_views, n, _ = embeds.shape
    loss = jnp.float32(0.0)
    for i in range(n_views):
        for j in range(n_views):
            # `~(j == i)` in the original code is always truthy -> no skip.
            logits = embeds[i] @ embeds[j].T
            logprob = jax.nn.log_softmax(logits, axis=1)
            loss = loss + (-jnp.sum(jnp.diag(logprob))) / n
    return loss / (n_views * (n_views - 1))


if __name__ == "__main__":
    # The module has no learnable parameters (__init__ is empty), so the only
    # inputs are the stacked view embeddings.
    n_views, n, d = 3, 8, 32
    key = jax.random.PRNGKey(0)
    embeds = jax.random.normal(key, (n_views, n, d), dtype=jnp.float32)

    loss = intra_view_contrastive_loss(embeds)
    loss = jax.block_until_ready(loss)

    ref = _reference_loss(embeds)
    assert jnp.allclose(loss, ref, rtol=1e-5, atol=1e-5), (loss, ref)

    print("KERNEL_OK")
</pallas_src>

<mosaic_0001>
module attributes {stable_mosaic.version = 11 : i64} {
  func.func @_intra_view_loss_kernel(%arg0: memref<3x8x32xf32, #tpu.memory_space<vmem>>, %arg1: memref<1x128xf32, #tpu.memory_space<vmem>>) attributes {dimension_semantics = [], scalar_prefetch = 0 : i64, scratch_operands = 0 : i64, tpu.core_type = #tpu.core_type<tc>} {
    %c0 = arith.constant 0 : index
    %c0_0 = arith.constant 0 : index
    %c0_1 = arith.constant 0 : index
    %0 = vector.load %arg0[%c0, %c0_0, %c0_1] : memref<3x8x32xf32, #tpu.memory_space<vmem>>, vector<1x8x32xf32>
    %1 = vector.shape_cast %0 : vector<1x8x32xf32> to vector<8x32xf32>
    %c0_2 = arith.constant 0 : index
    %c0_3 = arith.constant 0 : index
    %c0_4 = arith.constant 0 : index
    %2 = vector.load %arg0[%c0_2, %c0_3, %c0_4] : memref<3x8x32xf32, #tpu.memory_space<vmem>>, vector<1x8x32xf32>
    %3 = vector.shape_cast %2 : vector<1x8x32xf32> to vector<8x32xf32>
    %cst = arith.constant dense<0.000000e+00> : vector<8x8xf32>
    %4 = tpu.matmul %1, %3, %cst {dimension_numbers = #tpu.dot_dimension_numbers<[1], [1], [0], [0], [0, 0, 1, 0], [], []>} : vector<8x32xf32>, vector<8x32xf32>, vector<8x8xf32> -> vector<8x8xf32>
    %5 = arith.mulf %1, %3 : vector<8x32xf32>
    %6 = vector.shape_cast %5 : vector<8x32xf32> to vector<1x8x32xf32>
    %cst_5 = arith.constant dense<0.000000e+00> : vector<1xf32>
    %7 = vector.multi_reduction <add>, %6, %cst_5 [1, 2] : vector<1x8x32xf32> to vector<1xf32>
    %8 = vector.shape_cast %7 : vector<1xf32> to vector<1x1x1xf32>
    %9 = vector.extract %8[0, 0, 0] : f32 from vector<1x1x1xf32>
    %cst_6 = arith.constant dense<0xFF800000> : vector<8xf32>
    %10 = vector.multi_reduction <maximumf>, %4, %cst_6 [1] : vector<8x8xf32> to vector<8xf32>
    %11 = vector.shape_cast %10 : vector<8xf32> to vector<8x1xf32>
    %12 = vector.broadcast %11 : vector<8x1xf32> to vector<8x8xf32>
    %13 = arith.subf %4, %12 : vector<8x8xf32>
    %14 = math.exp %13 : vector<8x8xf32>
    %cst_7 = arith.constant dense<0.000000e+00> : vector<8xf32>
    %15 = vector.multi_reduction <add>, %14, %cst_7 [1] : vector<8x8xf32> to vector<8xf32>
    %16 = vector.shape_cast %15 : vector<8xf32> to vector<8x1xf32>
    %17 = math.log %16 : vector<8x1xf32>
    %18 = arith.addf %17, %11 : vector<8x1xf32>
    %19 = vector.shape_cast %18 : vector<8x1xf32> to vector<1x8x1xf32>
    %cst_8 = arith.constant dense<0.000000e+00> : vector<1xf32>
    %20 = vector.multi_reduction <add>, %19, %cst_8 [1, 2] : vector<1x8x1xf32> to vector<1xf32>
    %21 = vector.shape_cast %20 : vector<1xf32> to vector<1x1x1xf32>
    %22 = vector.extract %21[0, 0, 0] : f32 from vector<1x1x1xf32>
    %23 = arith.subf %22, %9 : f32
    %cst_9 = arith.constant 1.250000e-01 : f32
    %24 = arith.mulf %23, %cst_9 : f32
    %cst_10 = arith.constant 0.000000e+00 : f32
    %25 = arith.addf %cst_10, %24 : f32
    %c1 = arith.constant 1 : index
    %c0_11 = arith.constant 0 : index
    %c0_12 = arith.constant 0 : index
    %26 = vector.load %arg0[%c1, %c0_11, %c0_12] : memref<3x8x32xf32, #tpu.memory_space<vmem>>, vector<1x8x32xf32>
    %27 = vector.shape_cast %26 : vector<1x8x32xf32> to vector<8x32xf32>
    %cst_13 = arith.constant dense<0.000000e+00> : vector<8x8xf32>
    %28 = tpu.matmul %1, %27, %cst_13 {dimension_numbers = #tpu.dot_dimension_numbers<[1], [1], [0], [0], [0, 0, 1, 0], [], []>} : vector<8x32xf32>, vector<8x32xf32>, vector<8x8xf32> -> vector<8x8xf32>
    %29 = arith.mulf %1, %27 : vector<8x32xf32>
    %30 = vector.shape_cast %29 : vector<8x32xf32> to vector<1x8x32xf32>
    %cst_14 = arith.constant dense<0.000000e+00> : vector<1xf32>
    %31 = vector.multi_reduction <add>, %30, %cst_14 [1, 2] : vector<1x8x32xf32> to vector<1xf32>
    %32 = vector.shape_cast %31 : vector<1xf32> to vector<1x1x1xf32>
    %33 = vector.extract %32[0, 0, 0] : f32 from vector<1x1x1xf32>
    %cst_15 = arith.constant dense<0xFF800000> : vector<8xf32>
    %34 = vector.multi_reduction <maximumf>, %28, %cst_15 [1] : vector<8x8xf32> to vector<8xf32>
    %35 = vector.shape_cast %34 : vector<8xf32> to vector<8x1xf32>
    %36 = vector.broadcast %35 : vector<8x1xf32> to vector<8x8xf32>
    %37 = arith.subf %28, %36 : vector<8x8xf32>
    %38 = math.exp %37 : vector<8x8xf32>
    %cst_16 = arith.constant dense<0.000000e+00> : vector<8xf32>
    %39 = vector.multi_reduction <add>, %38, %cst_16 [1] : vector<8x8xf32> to vector<8xf32>
    %40 = vector.shape_cast %39 : vector<8xf32> to vector<8x1xf32>
    %41 = math.log %40 : vector<8x1xf32>
    %42 = arith.addf %41, %35 : vector<8x1xf32>
    %43 = vector.shape_cast %42 : vector<8x1xf32> to vector<1x8x1xf32>
    %cst_17 = arith.constant dense<0.000000e+00> : vector<1xf32>
    %44 = vector.multi_reduction <add>, %43, %cst_17 [1, 2] : vector<1x8x1xf32> to vector<1xf32>
    %45 = vector.shape_cast %44 : vector<1xf32> to vector<1x1x1xf32>
    %46 = vector.extract %45[0, 0, 0] : f32 from vector<1x1x1xf32>
    %47 = arith.subf %46, %33 : f32
    %cst_18 = arith.constant 1.250000e-01 : f32
    %48 = arith.mulf %47, %cst_18 : f32
    %49 = arith.addf %25, %48 : f32
    %50 = vector.shape_cast %35 : vector<8x1xf32> to vector<1x8x1xf32>
    %cst_19 = arith.constant dense<0xFF800000> : vector<1xf32>
    %51 = vector.multi_reduction <maximumf>, %50, %cst_19 [1, 2] : vector<1x8x1xf32> to vector<1xf32>
    %52 = vector.shape_cast %51 : vector<1xf32> to vector<1x1x1xf32>
    %53 = vector.extract %52[0, 0, 0] : f32 from vector<1x1x1xf32>
    %54 = vector.broadcast %53 : f32 to vector<8x1xf32>
    %55 = arith.subf %35, %54 : vector<8x1xf32>
    %56 = math.exp %55 : vector<8x1xf32>
    %57 = vector.broadcast %56 : vector<8x1xf32> to vector<8x8xf32>
    %58 = arith.mulf %38, %57 : vector<8x8xf32>
    %cst_20 = arith.constant dense<0.000000e+00> : vector<8xf32>
    %59 = vector.multi_reduction <add>, %58, %cst_20 [0] : vector<8x8xf32> to vector<8xf32>
    %60 = vector.shape_cast %59 : vector<8xf32> to vector<1x8xf32>
    %61 = math.log %60 : vector<1x8xf32>
    %62 = vector.broadcast %53 : f32 to vector<1x8xf32>
    %63 = arith.addf %61, %62 : vector<1x8xf32>
    %64 = vector.shape_cast %63 : vector<1x8xf32> to vector<1x1x8xf32>
    %cst_21 = arith.constant dense<0.000000e+00> : vector<1xf32>
    %65 = vector.multi_reduction <add>, %64, %cst_21 [1, 2] : vector<1x1x8xf32> to vector<1xf32>
    %66 = vector.shape_cast %65 : vector<1xf32> to vector<1x1x1xf32>
    %67 = vector.extract %66[0, 0, 0] : f32 from vector<1x1x1xf32>
    %68 = arith.subf %67, %33 : f32
    %cst_22 = arith.constant 1.250000e-01 : f32
    %69 = arith.mulf %68, %cst_22 : f32
    %70 = arith.addf %49, %69 : f32
    %c2 = arith.constant 2 : index
    %c0_23 = arith.constant 0 : index
    %c0_24 = arith.constant 0 : index
    %71 = vector.load %arg0[%c2, %c0_23, %c0_24] : memref<3x8x32xf32, #tpu.memory_space<vmem>>, vector<1x8x32xf32>
    %72 = vector.shape_cast %71 : vector<1x8x32xf32> to vector<8x32xf32>
    %cst_25 = arith.constant dense<0.000000e+00> : vector<8x8xf32>
    %73 = tpu.matmul %1, %72, %cst_25 {dimension_numbers = #tpu.dot_dimension_numbers<[1], [1], [0], [0], [0, 0, 1, 0], [], []>} : vector<8x32xf32>, vector<8x32xf32>, vector<8x8xf32> -> vector<8x8xf32>
    %74 = arith.mulf %1, %72 : vector<8x32xf32>
    %75 = vector.shape_cast %74 : vector<8x32xf32> to vector<1x8x32xf32>
    %cst_26 = arith.constant dense<0.000000e+00> : vector<1xf32>
    %76 = vector.multi_reduction <add>, %75, %cst_26 [1, 2] : vector<1x8x32xf32> to vector<1xf32>
    %77 = vector.shape_cast %76 : vector<1xf32> to vector<1x1x1xf32>
    %78 = vector.extract %77[0, 0, 0] : f32 from vector<1x1x1xf32>
    %cst_27 = arith.constant dense<0xFF800000> : vector<8xf32>
    %79 = vector.multi_reduction <maximumf>, %73, %cst_27 [1] : vector<8x8xf32> to vector<8xf32>
    %80 = vector.shape_cast %79 : vector<8xf32> to vector<8x1xf32>
    %81 = vector.broadcast %80 : vector<8x1xf32> to vector<8x8xf32>
    %82 = arith.subf %73, %81 : vector<8x8xf32>
    %83 = math.exp %82 : vector<8x8xf32>
    %cst_28 = arith.constant dense<0.000000e+00> : vector<8xf32>
    %84 = vector.multi_reduction <add>, %83, %cst_28 [1] : vector<8x8xf32> to vector<8xf32>
    %85 = vector.shape_cast %84 : vector<8xf32> to vector<8x1xf32>
    %86 = math.log %85 : vector<8x1xf32>
    %87 = arith.addf %86, %80 : vector<8x1xf32>
    %88 = vector.shape_cast %87 : vector<8x1xf32> to vector<1x8x1xf32>
    %cst_29 = arith.constant dense<0.000000e+00> : vector<1xf32>
    %89 = vector.multi_reduction <add>, %88, %cst_29 [1, 2] : vector<1x8x1xf32> to vector<1xf32>
    %90 = vector.shape_cast %89 : vector<1xf32> to vector<1x1x1xf32>
    %91 = vector.extract %90[0, 0, 0] : f32 from vector<1x1x1xf32>
    %92 = arith.subf %91, %78 : f32
    %cst_30 = arith.constant 1.250000e-01 : f32
    %93 = arith.mulf %92, %cst_30 : f32
    %94 = arith.addf %70, %93 : f32
    %95 = vector.shape_cast %80 : vector<8x1xf32> to vector<1x8x1xf32>
    %cst_31 = arith.constant dense<0xFF800000> : vector<1xf32>
    %96 = vector.multi_reduction <maximumf>, %95, %cst_31 [1, 2] : vector<1x8x1xf32> to vector<1xf32>
    %97 = vector.shape_cast %96 : vector<1xf32> to vector<1x1x1xf32>
    %98 = vector.extract %97[0, 0, 0] : f32 from vector<1x1x1xf32>
    %99 = vector.broadcast %98 : f32 to vector<8x1xf32>
    %100 = arith.subf %80, %99 : vector<8x1xf32>
    %101 = math.exp %100 : vector<8x1xf32>
    %102 = vector.broadcast %101 : vector<8x1xf32> to vector<8x8xf32>
    %103 = arith.mulf %83, %102 : vector<8x8xf32>
    %cst_32 = arith.constant dense<0.000000e+00> : vector<8xf32>
    %104 = vector.multi_reduction <add>, %103, %cst_32 [0] : vector<8x8xf32> to vector<8xf32>
    %105 = vector.shape_cast %104 : vector<8xf32> to vector<1x8xf32>
    %106 = math.log %105 : vector<1x8xf32>
    %107 = vector.broadcast %98 : f32 to vector<1x8xf32>
    %108 = arith.addf %106, %107 : vector<1x8xf32>
    %109 = vector.shape_cast %108 : vector<1x8xf32> to vector<1x1x8xf32>
    %cst_33 = arith.constant dense<0.000000e+00> : vector<1xf32>
    %110 = vector.multi_reduction <add>, %109, %cst_33 [1, 2] : vector<1x1x8xf32> to vector<1xf32>
    %111 = vector.shape_cast %110 : vector<1xf32> to vector<1x1x1xf32>
    %112 = vector.extract %111[0, 0, 0] : f32 from vector<1x1x1xf32>
    %113 = arith.subf %112, %78 : f32
    %cst_34 = arith.constant 1.250000e-01 : f32
    %114 = arith.mulf %113, %cst_34 : f32
    %115 = arith.addf %94, %114 : f32
    %c1_35 = arith.constant 1 : index
    %c0_36 = arith.constant 0 : index
    %c0_37 = arith.constant 0 : index
    %116 = vector.load %arg0[%c1_35, %c0_36, %c0_37] : memref<3x8x32xf32, #tpu.memory_space<vmem>>, vector<1x8x32xf32>
    %117 = vector.shape_cast %116 : vector<1x8x32xf32> to vector<8x32xf32>
    %c1_38 = arith.constant 1 : index
    %c0_39 = arith.constant 0 : index
    %c0_40 = arith.constant 0 : index
    %118 = vector.load %arg0[%c1_38, %c0_39, %c0_40] : memref<3x8x32xf32, #tpu.memory_space<vmem>>, vector<1x8x32xf32>
    %119 = vector.shape_cast %118 : vector<1x8x32xf32> to vector<8x32xf32>
    %cst_41 = arith.constant dense<0.000000e+00> : vector<8x8xf32>
    %120 = tpu.matmul %117, %119, %cst_41 {dimension_numbers = #tpu.dot_dimension_numbers<[1], [1], [0], [0], [0, 0, 1, 0], [], []>} : vector<8x32xf32>, vector<8x32xf32>, vector<8x8xf32> -> vector<8x8xf32>
    %121 = arith.mulf %117, %119 : vector<8x32xf32>
    %122 = vector.shape_cast %121 : vector<8x32xf32> to vector<1x8x32xf32>
    %cst_42 = arith.constant dense<0.000000e+00> : vector<1xf32>
    %123 = vector.multi_reduction <add>, %122, %cst_42 [1, 2] : vector<1x8x32xf32> to vector<1xf32>
    %124 = vector.shape_cast %123 : vector<1xf32> to vector<1x1x1xf32>
    %125 = vector.extract %124[0, 0, 0] : f32 from vector<1x1x1xf32>
    %cst_43 = arith.constant dense<0xFF800000> : vector<8xf32>
    %126 = vector.multi_reduction <maximumf>, %120, %cst_43 [1] : vector<8x8xf32> to vector<8xf32>
    %127 = vector.shape_cast %126 : vector<8xf32> to vector<8x1xf32>
    %128 = vector.broadcast %127 : vector<8x1xf32> to vector<8x8xf32>
    %129 = arith.subf %120, %128 : vector<8x8xf32>
    %130 = math.exp %129 : vector<8x8xf32>
    %cst_44 = arith.constant dense<0.000000e+00> : vector<8xf32>
    %131 = vector.multi_reduction <add>, %130, %cst_44 [1] : vector<8x8xf32> to vector<8xf32>
    %132 = vector.shape_cast %131 : vector<8xf32> to vector<8x1xf32>
    %133 = math.log %132 : vector<8x1xf32>
    %134 = arith.addf %133, %127 : vector<8x1xf32>
    %135 = vector.shape_cast %134 : vector<8x1xf32> to vector<1x8x1xf32>
    %cst_45 = arith.constant dense<0.000000e+00> : vector<1xf32>
    %136 = vector.multi_reduction <add>, %135, %cst_45 [1, 2] : vector<1x8x1xf32> to vector<1xf32>
    %137 = vector.shape_cast %136 : vector<1xf32> to vector<1x1x1xf32>
    %138 = vector.extract %137[0, 0, 0] : f32 from vector<1x1x1xf32>
    %139 = arith.subf %138, %125 : f32
    %cst_46 = arith.constant 1.250000e-01 : f32
    %140 = arith.mulf %139, %cst_46 : f32
    %141 = arith.addf %115, %140 : f32
    %c2_47 = arith.constant 2 : index
    %c0_48 = arith.constant 0 : index
    %c0_49 = arith.constant 0 : index
    %142 = vector.load %arg0[%c2_47, %c0_48, %c0_49] : memref<3x8x32xf32, #tpu.memory_space<vmem>>, vector<1x8x32xf32>
    %143 = vector.shape_cast %142 : vector<1x8x32xf32> to vector<8x32xf32>
    %cst_50 = arith.constant dense<0.000000e+00> : vector<8x8xf32>
    %144 = tpu.matmul %117, %143, %cst_50 {dimension_numbers = #tpu.dot_dimension_numbers<[1], [1], [0], [0], [0, 0, 1, 0], [], []>} : vector<8x32xf32>, vector<8x32xf32>, vector<8x8xf32> -> vector<8x8xf32>
    %145 = arith.mulf %117, %143 : vector<8x32xf32>
    %146 = vector.shape_cast %145 : vector<8x32xf32> to vector<1x8x32xf32>
    %cst_51 = arith.constant dense<0.000000e+00> : vector<1xf32>
    %147 = vector.multi_reduction <add>, %146, %cst_51 [1, 2] : vector<1x8x32xf32> to vector<1xf32>
    %148 = vector.shape_cast %147 : vector<1xf32> to vector<1x1x1xf32>
    %149 = vector.extract %148[0, 0, 0] : f32 from vector<1x1x1xf32>
    %cst_52 = arith.constant dense<0xFF800000> : vector<8xf32>
    %150 = vector.multi_reduction <maximumf>, %144, %cst_52 [1] : vector<8x8xf32> to vector<8xf32>
    %151 = vector.shape_cast %150 : vector<8xf32> to vector<8x1xf32>
    %152 = vector.broadcast %151 : vector<8x1xf32> to vector<8x8xf32>
    %153 = arith.subf %144, %152 : vector<8x8xf32>
    %154 = math.exp %153 : vector<8x8xf32>
    %cst_53 = arith.constant dense<0.000000e+00> : vector<8xf32>
    %155 = vector.multi_reduction <add>, %154, %cst_53 [1] : vector<8x8xf32> to vector<8xf32>
    %156 = vector.shape_cast %155 : vector<8xf32> to vector<8x1xf32>
    %157 = math.log %156 : vector<8x1xf32>
    %158 = arith.addf %157, %151 : vector<8x1xf32>
    %159 = vector.shape_cast %158 : vector<8x1xf32> to vector<1x8x1xf32>
    %cst_54 = arith.constant dense<0.000000e+00> : vector<1xf32>
    %160 = vector.multi_reduction <add>, %159, %cst_54 [1, 2] : vector<1x8x1xf32> to vector<1xf32>
    %161 = vector.shape_cast %160 : vector<1xf32> to vector<1x1x1xf32>
    %162 = vector.extract %161[0, 0, 0] : f32 from vector<1x1x1xf32>
    %163 = arith.subf %162, %149 : f32
    %cst_55 = arith.constant 1.250000e-01 : f32
    %164 = arith.mulf %163, %cst_55 : f32
    %165 = arith.addf %141, %164 : f32
    %166 = vector.shape_cast %151 : vector<8x1xf32> to vector<1x8x1xf32>
    %cst_56 = arith.constant dense<0xFF800000> : vector<1xf32>
    %167 = vector.multi_reduction <maximumf>, %166, %cst_56 [1, 2] : vector<1x8x1xf32> to vector<1xf32>
    %168 = vector.shape_cast %167 : vector<1xf32> to vector<1x1x1xf32>
    %169 = vector.extract %168[0, 0, 0] : f32 from vector<1x1x1xf32>
    %170 = vector.broadcast %169 : f32 to vector<8x1xf32>
    %171 = arith.subf %151, %170 : vector<8x1xf32>
    %172 = math.exp %171 : vector<8x1xf32>
    %173 = vector.broadcast %172 : vector<8x1xf32> to vector<8x8xf32>
    %174 = arith.mulf %154, %173 : vector<8x8xf32>
    %cst_57 = arith.constant dense<0.000000e+00> : vector<8xf32>
    %175 = vector.multi_reduction <add>, %174, %cst_57 [0] : vector<8x8xf32> to vector<8xf32>
    %176 = vector.shape_cast %175 : vector<8xf32> to vector<1x8xf32>
    %177 = math.log %176 : vector<1x8xf32>
    %178 = vector.broadcast %169 : f32 to vector<1x8xf32>
    %179 = arith.addf %177, %178 : vector<1x8xf32>
    %180 = vector.shape_cast %179 : vector<1x8xf32> to vector<1x1x8xf32>
    %cst_58 = arith.constant dense<0.000000e+00> : vector<1xf32>
    %181 = vector.multi_reduction <add>, %180, %cst_58 [1, 2] : vector<1x1x8xf32> to vector<1xf32>
    %182 = vector.shape_cast %181 : vector<1xf32> to vector<1x1x1xf32>
    %183 = vector.extract %182[0, 0, 0] : f32 from vector<1x1x1xf32>
    %184 = arith.subf %183, %149 : f32
    %cst_59 = arith.constant 1.250000e-01 : f32
    %185 = arith.mulf %184, %cst_59 : f32
    %186 = arith.addf %165, %185 : f32
    %c2_60 = arith.constant 2 : index
    %c0_61 = arith.constant 0 : index
    %c0_62 = arith.constant 0 : index
    %187 = vector.load %arg0[%c2_60, %c0_61, %c0_62] : memref<3x8x32xf32, #tpu.memory_space<vmem>>, vector<1x8x32xf32>
    %188 = vector.shape_cast %187 : vector<1x8x32xf32> to vector<8x32xf32>
    %c2_63 = arith.constant 2 : index
    %c0_64 = arith.constant 0 : index
    %c0_65 = arith.constant 0 : index
    %189 = vector.load %arg0[%c2_63, %c0_64, %c0_65] : memref<3x8x32xf32, #tpu.memory_space<vmem>>, vector<1x8x32xf32>
    %190 = vector.shape_cast %189 : vector<1x8x32xf32> to vector<8x32xf32>
    %cst_66 = arith.constant dense<0.000000e+00> : vector<8x8xf32>
    %191 = tpu.matmul %188, %190, %cst_66 {dimension_numbers = #tpu.dot_dimension_numbers<[1], [1], [0], [0], [0, 0, 1, 0], [], []>} : vector<8x32xf32>, vector<8x32xf32>, vector<8x8xf32> -> vector<8x8xf32>
    %192 = arith.mulf %188, %190 : vector<8x32xf32>
    %193 = vector.shape_cast %192 : vector<8x32xf32> to vector<1x8x32xf32>
    %cst_67 = arith.constant dense<0.000000e+00> : vector<1xf32>
    %194 = vector.multi_reduction <add>, %193, %cst_67 [1, 2] : vector<1x8x32xf32> to vector<1xf32>
    %195 = vector.shape_cast %194 : vector<1xf32> to vector<1x1x1xf32>
    %196 = vector.extract %195[0, 0, 0] : f32 from vector<1x1x1xf32>
    %cst_68 = arith.constant dense<0xFF800000> : vector<8xf32>
    %197 = vector.multi_reduction <maximumf>, %191, %cst_68 [1] : vector<8x8xf32> to vector<8xf32>
    %198 = vector.shape_cast %197 : vector<8xf32> to vector<8x1xf32>
    %199 = vector.broadcast %198 : vector<8x1xf32> to vector<8x8xf32>
    %200 = arith.subf %191, %199 : vector<8x8xf32>
    %201 = math.exp %200 : vector<8x8xf32>
    %cst_69 = arith.constant dense<0.000000e+00> : vector<8xf32>
    %202 = vector.multi_reduction <add>, %201, %cst_69 [1] : vector<8x8xf32> to vector<8xf32>
    %203 = vector.shape_cast %202 : vector<8xf32> to vector<8x1xf32>
    %204 = math.log %203 : vector<8x1xf32>
    %205 = arith.addf %204, %198 : vector<8x1xf32>
    %206 = vector.shape_cast %205 : vector<8x1xf32> to vector<1x8x1xf32>
    %cst_70 = arith.constant dense<0.000000e+00> : vector<1xf32>
    %207 = vector.multi_reduction <add>, %206, %cst_70 [1, 2] : vector<1x8x1xf32> to vector<1xf32>
    %208 = vector.shape_cast %207 : vector<1xf32> to vector<1x1x1xf32>
    %209 = vector.extract %208[0, 0, 0] : f32 from vector<1x1x1xf32>
    %210 = arith.subf %209, %196 : f32
    %cst_71 = arith.constant 1.250000e-01 : f32
    %211 = arith.mulf %210, %cst_71 : f32
    %212 = arith.addf %186, %211 : f32
    %cst_72 = arith.constant 0.166666672 : f32
    %213 = arith.mulf %212, %cst_72 : f32
    %214 = vector.broadcast %213 : f32 to vector<1x128xf32>
    %c0_73 = arith.constant 0 : index
    %c0_74 = arith.constant 0 : index
    %215 = vector.load %arg1[%c0_73, %c0_74] : memref<1x128xf32, #tpu.memory_space<vmem>>, vector<1x128xf32>
    tpu.vector_store %arg1[%c0_73, %c0_74], %214 {strides = array<i32>} : memref<1x128xf32, #tpu.memory_space<vmem>>, vector<1x128xf32>,
    return
  }
}

</mosaic_0001>

<bundles_post_ra>
// kernel: tpu_custom_call.1
= control target key start
LH: loop header
LB: loop body
LE: loop exit
PB: predicated region body
PF: predicated region fallthrough
CT: control target
= control target key end

     0   :  { %6 = vsyncpa [#allocation3], 0  ;;  %s1162_s0 = inlined_call_operand.hbm [shape: f32[3,8,32], index: 0, kind: input, shape index: {}]   ;;  %s1163_s1 = inlined_call_operand.hbm [shape: f32[1,128], index: 1, kind: output, shape index: {}]  }
   0x1   :  { %7 = vsyncpa [#allocation4], 0  ;;  %s976_s6 = smov [#allocation2]  }
   0x2   :  { %s13_s7 = sshll.u32 %s976_s6, 4  ;;  %s14_s7 = int_to_ptr.vmem [resolvable:$true] %s13_s7 }
   0x3   :  { %s940_s8 = scalar_lea.vmem %s14_s7, 384  ;;  %p945_p1 = scmp.lt.s32.totalorder %s14_s7, %s14_s7 }
   0x4   :  { %p941_p0 = scmp.ne.s32.totalorder %s14_s7, %s940_s8  ;;  %p946_p2 = scmp.lt.s32.totalorder %s940_s8, %s940_s8 }
   0x6   :  { %p947_p3 = por %p946_p2, %p945_p1 }
   0x8   :  { %p948_p4 = pnand %p947_p3, %p941_p0 }
   0xa   :  { %951 = shalt.err (!%p948_p4)
}
   0xb   :  { %s977_s9 = smov 128   ;;  %s978_s10 = smov 8  }
   0xc   :  { %19 = dma.hbm_to_vmem [thread:$0]  %s1162_s0, 384, %s14_s7, [#allocation3], %s977_s9, %s977_s9, %s978_s10  }
   0xd   :  { %972 = dma.done.wait [#allocation3], 384  }
   0xe   :  { %973 = vsyncadd [#allocation3], 4294966912  ;;  %v979_v0 = vmov 0.0   ;;  %vm980_vm0 = vmmov 0   ;;  %vm24_vm1 = vcmask 261120   ;;  %v997_v1 = vld [vmem:[#allocation2] sm:$0xff] }
   0xf   :  { %824 = vmatprep.subr.mxu0 %v979_v0  ;;  %829 = vmatprep.subr.mxu1 %v979_v0  ;;  %v999_v2 = vld [vmem:[#allocation2 + $0x8] sm:$0xff]  ;;  %v1005_v3 = vld [vmem:[#allocation2 + $0x10] sm:$0xff]  ;;  %vm109_vm2 = vcmask 64512   ;;  %v98_v10 = vmul.f32 %v997_v1, %v997_v1  ;;  %vm122_vm3 = vcmask 7168   ;;  %vm269_vm4 = vcmask 57344  }
  0x10   :  { %826 = vmatprep.mubr.msk.f32.mxu0 %vm980_vm0, %v979_v0  ;;  %831 = vmatprep.mubr.msk.f32.mxu1 %vm980_vm0, %v979_v0  ;;  %v211_v14 = vmul.f32 %v999_v2, %v997_v1  ;;  %v358_v51 = vmul.f32 %v1005_v3, %v997_v1 }
  0x11   :  { %825 = vmatpush3.xpose.msk.msra.mxu0 %vm24_vm1, %v997_v1  ;;  %830 = vmatpush3.xpose.msk.msra.mxu1 %vm24_vm1, %v999_v2  ;;  %v99_v13 = vsel %vm24_vm1, %v98_v10, 0.0 }
  0x12   :  { %834 = vmatprep.subr.mxu0 %v979_v0  ;;  %839 = vmatprep.subr.mxu1 %v979_v0  ;;  %v212_v15 = vsel %vm24_vm1, %v211_v14, 0.0  ;;  %v359_v53 = vsel %vm24_vm1, %v358_v51, 0.0 }
  0x14   :  { %827 = vmatmul.mubr.msk.f32.vlgmr.msra.gmra.mxu0 %vm24_vm1, %v997_v1  ;;  %832 = vmatmul.mubr.msk.f32.vlgmr.msra.gmra.mxu1 %vm24_vm1, %v997_v1 }
  0x15   :  { %835 = vmatpush3.xpose.msk.msra.mxu0 %vm24_vm1, %v1005_v3  ;;  %836 = vmatprep.mubr.msk.f32.mxu0 %vm980_vm0, %v979_v0 }
  0x16   :  { %840 = vmatpush3.xpose.msk.msra.mxu1 %vm24_vm1, %v999_v2  ;;  %841 = vmatprep.mubr.msk.f32.mxu1 %vm980_vm0, %v979_v0 }
  0x17   :  { %844 = vmatprep.subr.mxu0 %v979_v0  ;;  %849 = vmatprep.subr.mxu1 %v979_v0 }
  0x18   :  { %837 = vmatmul.mubr.msk.f32.vlgmr.msra.gmra.mxu0 %vm24_vm1, %v997_v1 }
  0x19   :  { %842 = vmatmul.mubr.msk.f32.vlgmr.msra.gmra.mxu1 %vm24_vm1, %v999_v2  ;;  %845 = vmatpush3.xpose.msk.msra.mxu0 %vm24_vm1, %v1005_v3 }
  0x1a   :  { %846 = vmatprep.mubr.msk.f32.mxu0 %vm980_vm0, %v979_v0  ;;  %850 = vmatpush3.xpose.msk.msra.mxu1 %vm24_vm1, %v1005_v3 }
  0x1b   :  { %851 = vmatprep.mubr.msk.f32.mxu1 %vm980_vm0, %v979_v0 }
  0x1c   :  { %847 = vmatmul.mubr.msk.f32.vlgmr.msra.gmra.mxu0 %vm24_vm1, %v999_v2 }
  0x1d   :  { %852 = vmatmul.mubr.msk.f32.vlgmr.msra.gmra.mxu1 %vm24_vm1, %v1005_v3 }
  0xd4   :  { %v94_v4 = vpop.f32.mrf.mxu0  ;;  %v207_v5 = vpop.f32.mrf.mxu1 }
  0xd5   :  { %v110_v6 = vsel %vm109_vm2, %v94_v4, -inf  ;;  %v222_v9 = vsel %vm109_vm2, %v207_v5, -inf }
  0xd6   :  { %111 = vmax.xlane.f32.xlu0 %v110_v6  ;;  %v828_v7 = vpop.f32.mrf.mxu0  ;;  %v833_v8 = vpop.f32.mrf.mxu1 }
  0xd8   :  { %v354_v11 = vpop.f32.mrf.mxu0 }
  0xd9   :  { %v369_v16 = vsel %vm109_vm2, %v354_v11, -inf  ;;  %v1048_v31 = vpop.f32.mrf.mxu1 }
  0xda   :  { %223 = vmax.xlane.f32.xlu0 %v222_v9  ;;  %v838_v12 = vpop.f32.mrf.mxu0  ;;  %v510_v54 = vsel %vm109_vm2, %v1048_v31, -inf }
  0xdb   :  { %v843_v32 = vpop.f32.mrf.mxu1 }
  0xdc   :  { %v1066_v58 = vpop.f32.mrf.mxu0 }
  0xdd   :  { %v1090_v51 = vpop.f32.mrf.mxu1 }
  0xde   :  { %100 = vadd.xlane.f32.xlu0 %v99_v13  ;;  %v848_v59 = vpop.f32.mrf.mxu0 }
  0xe2   :  { %213 = vadd.xlane.f32.xlu0 %v212_v15 }
  0xe6   :  { %370 = vmax.xlane.f32.xlu0 %v369_v16 }
 0x15f   :  { %v112_v17 = vpop.xlane.xlu0 %111 }
 0x160   :  { %v113_v18 = vsub.f32 %v94_v4, %v112_v17 }
 0x162   :  { %v114_v19 = vmul.f32 1.442695, %v113_v18 }
 0x163   :  { %v1040_v20 = vpop.xlane.xlu0 %223 }
 0x164   :  { %896 = vpow2.f32 %v114_v19  ;;  %v225_v21 = vsub.f32 %v207_v5, %v1040_v20  ;;  %v247_v57 = vrot.slane %v1040_v20, 4 }
 0x166   :  { %v226_v22 = vmul.f32 1.442695, %v225_v21  ;;  %v248_v62 = vmax.f32 %v1040_v20, %v247_v57 }
 0x167   :  { %v101_v27 = vpop.xlane.xlu0 %100 }
 0x168   :  { %898 = vpow2.f32 %v226_v22  ;;  %v102_v28 = vrot.slane %v101_v27, 4  ;;  %v249_v5 = vrot.slane %v248_v62, 2 }
 0x16a   :  { %v103_v29 = vadd.f32 %v102_v28, %v101_v27  ;;  %v250_v12 = vmax.f32 %v248_v62, %v249_v5 }
 0x16b   :  { %v214_v36 = vpop.xlane.xlu0 %213 }
 0x16c   :  { %v104_v30 = vrot.slane %v103_v29, 2  ;;  %v215_v55 = vrot.slane %v214_v36, 4  ;;  %v251_v18 = vrot.slane %v250_v12, 1 }
 0x16e   :  { %v105_v33 = vadd.f32 %v104_v30, %v103_v29  ;;  %v216_v56 = vadd.f32 %v215_v55, %v214_v36 }
 0x16f   :  { %v1050_v37 = vpop.xlane.xlu0 %370 }
 0x170   :  { %v106_v34 = vrot.slane %v105_v33, 1  ;;  %v372_v39 = vsub.f32 %v354_v11, %v1050_v37  ;;  %v217_v60 = vrot.slane %v216_v56, 2 }
 0x171   :  { %v897_v23 = vpop.eup %896 }
 0x172   :  { %v116_v24 = vsel %vm109_vm2, %v897_v23, 0.0  ;;  %v107_v35 = vadd.f32 %v106_v34, %v105_v33  ;;  %v373_v41 = vmul.f32 1.442695, %v372_v39  ;;  %v218_v4 = vadd.f32 %v217_v60, %v216_v56 }
 0x173   :  { %117 = vadd.xlane.f32.xlu1 %v116_v24  ;;  %v252_v23 = vmax.f32 %v250_v12, %v251_v18 }
 0x174   :  { %854 = vpush %v107_v35  ;;  %v219_v11 = vrot.slane %v218_v4, 1 }
 0x175   :  { %v1044_v25 = vpop.eup %898 }
 0x176   :  { %v228_v26 = vsel %vm109_vm2, %v1044_v25, 0.0 }
 0x177   :  { %229 = vadd.xlane.f32.xlu1 %v228_v26 }
 0x1a5   :  { %s855_s0 = spop %854 }
 0x1fc   :  { %v118_v38 = vpop.xlane.xlu1 %117 }
 0x1fd   :  { %900 = vlog2.f32 %v118_v38 }
 0x200   :  { %v230_v40 = vpop.xlane.xlu1 %229 }
 0x201   :  { %902 = vlog2.f32 %v230_v40 }
 0x202   :  { %904 = vpow2.f32 %v373_v41 }
 0x20a   :  { %v901_v42 = vpop.eup %900 }
 0x20b   :  { %v120_v43 = vmul.f32 0.6931472, %v901_v42 }
 0x20d   :  { %v121_v44 = vadd.f32 %v120_v43, %v112_v17  ;;  %v220_v17 = vadd.f32 %v219_v11, %v218_v4 }
 0x20e   :  { %v903_v45 = vpop.eup %902 }
 0x20f   :  { %v232_v46 = vmul.f32 0.6931472, %v903_v45  ;;  %v123_v47 = vsel %vm122_vm3, %v121_v44, 0.0  ;;  %v1056_v50 = vpop.eup %904 }
 0x210   :  { %124 = vadd.xlane.f32.xlu1 %v123_v47  ;;  %v375_v52 = vsel %vm109_vm2, %v1056_v50, 0.0 }
 0x211   :  { %v233_v48 = vadd.f32 %v232_v46, %v1040_v20 }
 0x213   :  { %v234_v49 = vsel %vm122_vm3, %v233_v48, 0.0 }
 0x214   :  { %235 = vadd.xlane.f32.xlu1 %v234_v49  ;;  %v616_v49 = vsel %vm109_vm2, %v1066_v58, -inf }
 0x218   :  { %376 = vadd.xlane.f32.xlu1 %v375_v52  ;;  %v853_v52 = vpop.f32.mrf.mxu1 }
 0x21c   :  { %360 = vadd.xlane.f32.xlu1 %v359_v53 }
 0x220   :  { %511 = vmax.xlane.f32.xlu1 %v510_v54 }
 0x299   :  { %v125_v61 = vpop.xlane.xlu1 %124 }
 0x29a   :  { %v126_v63 = vrot.slane %v125_v61, 4 }
 0x29c   :  { %v127_v0 = vadd.f32 %v126_v63, %v125_v61  ;;  %v394_v61 = vrot.slane %v1050_v37, 4 }
 0x29d   :  { %v236_v1 = vpop.xlane.xlu1 %235 }
 0x29e   :  { %v128_v6 = vrot.slane %v127_v0, 2  ;;  %v237_v7 = vrot.slane %v236_v1, 4 }
 0x2a0   :  { %v238_v8 = vadd.f32 %v237_v7, %v236_v1  ;;  %v129_v9 = vadd.f32 %v128_v6, %v127_v0  ;;  %v395_v0 = vmax.f32 %v1050_v37, %v394_v61 }
 0x2a1   :  { %v377_v10 = vpop.xlane.xlu1 %376 }
 0x2a2   :  { %v239_v13 = vrot.slane %v238_v8, 2  ;;  %v130_v14 = vrot.slane %v129_v9, 1  ;;  %v396_v7 = vrot.slane %v395_v0, 2 }
 0x2a4   :  { %v131_v15 = vadd.f32 %v130_v14, %v129_v9  ;;  %v240_v16 = vadd.f32 %v239_v13, %v238_v8  ;;  %v397_v14 = vmax.f32 %v395_v0, %v396_v7 }
 0x2a5   :  { %v1069_v19 = vpop.xlane.xlu1 %360 }
 0x2a6   :  { %856 = vpush %v131_v15  ;;  %v241_v21 = vrot.slane %v240_v16, 1  ;;  %v362_v59 = vrot.slane %v1069_v19, 4 }
 0x2a7   :  { %858 = vpush %v220_v17 }
 0x2a8   :  { %v242_v22 = vadd.f32 %v241_v21, %v240_v16  ;;  %v363_v60 = vadd.f32 %v362_v59, %v1069_v19 }
 0x2a9   :  { %v512_v24 = vpop.xlane.xlu1 %511 }
 0x2aa   :  { %860 = vpush %v242_v22  ;;  %v513_v26 = vsub.f32 %v1048_v31, %v512_v24  ;;  %v364_v62 = vrot.slane %v363_v60, 2 }
 0x2ab   :  { %862 = vpush %v252_v23  ;;  %v398_v23 = vrot.slane %v397_v14, 1 }
 0x2ac   :  { %v514_v27 = vmul.f32 1.442695, %v513_v26  ;;  %v365_v6 = vadd.f32 %v364_v62, %v363_v60 }
 0x2ae   :  { %906 = vpow2.f32 %v514_v27  ;;  %v366_v13 = vrot.slane %v365_v6, 1  ;;  %v399_v27 = vmax.f32 %v397_v14, %v398_v23 }
 0x2b0   :  { %v367_v22 = vadd.f32 %v366_v13, %v365_v6 }
 0x2bb   :  { %v907_v28 = vpop.eup %906 }
 0x2bc   :  { %v516_v29 = vsel %vm109_vm2, %v907_v28, 0.0  ;;  %v499_v28 = vmul.f32 %v999_v2, %v999_v2 }
 0x2bd   :  { %517 = vadd.xlane.f32.xlu1 %v516_v29 }
 0x2d7   :  { %s857_s13 = spop %856 }
 0x2d8   :  { %s133_s14 = ssub.f32 %s857_s13, %s855_s0  ;;  %s1073_s15 = spop %858 }
 0x2da   :  { %s1076_s19 = smul.f32 0.125, %s133_s14 }
 0x2db   :  { %s861_s16 = spop %860 }
 0x2dc   :  { %s244_s17 = ssub.f32 %s861_s16, %s1073_s15  ;;  %s863_s18 = spop %862 }
 0x2dd   :  { %v254_v30 = vstv %s863_s18 }
 0x2de   :  { %s1078_s20 = smul.f32 0.125, %s244_s17  ;;  %v255_v31 = vsub.f32 %v1040_v20, %v254_v30 }
 0x2e0   :  { %s246_s21 = sadd.f32 %s1078_s20, %s1076_s19  ;;  %v256_v32 = vmul.f32 1.442695, %v255_v31  ;;  %v605_v31 = vmul.f32 %v1005_v3, %v999_v2 }
 0x2e2   :  { %908 = vpow2.f32 %v256_v32  ;;  %v606_v32 = vsel %vm24_vm1, %v605_v31, 0.0 }
 0x2e3   :  { %910 = vlog2.f32 %v377_v10 }
 0x2ef   :  { %v909_v33 = vpop.eup %908 }
 0x2f0   :  { %v258_v34 = vmul.f32 %v909_v33, %v1044_v25  ;;  %v911_v43 = vpop.eup %910  ;;  %v757_v33 = vsel %vm109_vm2, %v1090_v51, -inf }
 0x2f1   :  { %v379_v45 = vmul.f32 0.6931472, %v911_v43 }
 0x2f2   :  { %v259_v35 = vsel %vm109_vm2, %v258_v34, 0.0 }
 0x2f3   :  { %v260_v36 = vrot.slane %v259_v35, 4  ;;  %v380_v25 = vadd.f32 %v379_v45, %v1050_v37 }
 0x2f5   :  { %v261_v38 = vadd.f32 %v260_v36, %v259_v35  ;;  %v381_v48 = vsel %vm122_vm3, %v380_v25, 0.0 }
 0x2f7   :  { %v262_v39 = vrot.slane %v261_v38, 2 }
 0x2f9   :  { %v263_v40 = vadd.f32 %v262_v39, %v261_v38 }
 0x2fb   :  { %v264_v41 = vrot.slane %v263_v40, 1 }
 0x2fd   :  { %v265_v42 = vadd.f32 %v264_v41, %v263_v40 }
 0x2ff   :  { %912 = vlog2.f32 %v265_v42 }
 0x30c   :  { %v913_v44 = vpop.eup %912 }
 0x30d   :  { %v267_v20 = vmul.f32 0.6931472, %v913_v44 }
 0x30f   :  { %v268_v46 = vadd.f32 %v267_v20, %v254_v30  ;;  %v500_v30 = vsel %vm24_vm1, %v499_v28, 0.0 }
 0x311   :  { %v270_v47 = vsel %vm269_vm4, %v268_v46, 0.0 }
 0x312   :  { %271 = vadd.xlane.f32.xlu0 %v270_v47 }
 0x316   :  { %382 = vadd.xlane.f32.xlu0 %v381_v48 }
 0x31a   :  { %617 = vmax.xlane.f32.xlu0 %v616_v49 }
 0x346   :  { %v518_v53 = vpop.xlane.xlu1 %517 }
 0x347   :  { %914 = vlog2.f32 %v518_v53 }
 0x354   :  { %v915_v54 = vpop.eup %914 }
 0x355   :  { %v520_v55 = vmul.f32 0.6931472, %v915_v54 }
 0x357   :  { %v521_v56 = vadd.f32 %v520_v55, %v512_v24 }
 0x359   :  { %v522_v57 = vsel %vm122_vm3, %v521_v56, 0.0 }
 0x35a   :  { %523 = vadd.xlane.f32.xlu1 %v522_v57 }
 0x39b   :  { %v272_v63 = vpop.xlane.xlu0 %271 }
 0x39c   :  { %v273_v1 = vrot.slane %v272_v63, 4 }
 0x39e   :  { %v274_v4 = vadd.f32 %v273_v1, %v272_v63 }
 0x39f   :  { %v383_v5 = vpop.xlane.xlu0 %382 }
 0x3a0   :  { %v275_v8 = vrot.slane %v274_v4, 2  ;;  %v384_v9 = vrot.slane %v383_v5, 4 }
 0x3a2   :  { %v385_v10 = vadd.f32 %v384_v9, %v383_v5  ;;  %v276_v11 = vadd.f32 %v275_v8, %v274_v4 }
 0x3a3   :  { %v1097_v12 = vpop.xlane.xlu0 %617 }
 0x3a4   :  { %v386_v15 = vrot.slane %v385_v10, 2  ;;  %v619_v16 = vsub.f32 %v1066_v58, %v1097_v12  ;;  %v277_v17 = vrot.slane %v276_v11, 1 }
 0x3a6   :  { %v620_v18 = vmul.f32 1.442695, %v619_v16  ;;  %v278_v19 = vadd.f32 %v277_v17, %v276_v11  ;;  %v387_v21 = vadd.f32 %v386_v15, %v385_v10 }
 0x3a8   :  { %916 = vpow2.f32 %v620_v18  ;;  %864 = vpush %v278_v19  ;;  %v388_v24 = vrot.slane %v387_v21, 1 }
 0x3a9   :  { %866 = vpush %v367_v22 }
 0x3aa   :  { %v389_v26 = vadd.f32 %v388_v24, %v387_v21 }
 0x3ac   :  { %868 = vpush %v389_v26 }
 0x3ad   :  { %870 = vpush %v399_v27  ;;  %v746_v27 = vmul.f32 %v1005_v3, %v1005_v3 }
 0x3af   :  { %v747_v28 = vsel %vm24_vm1, %v746_v27, 0.0 }
 0x3b5   :  { %v1103_v58 = vpop.eup %916 }
 0x3b6   :  { %v622_v29 = vsel %vm109_vm2, %v1103_v58, 0.0 }
 0x3b7   :  { %623 = vadd.xlane.f32.xlu0 %v622_v29  ;;  %v641_v29 = vrot.slane %v1097_v12, 4 }
 0x3bb   :  { %501 = vadd.xlane.f32.xlu0 %v500_v30  ;;  %v642_v30 = vmax.f32 %v1097_v12, %v641_v29 }
 0x3bf   :  { %607 = vadd.xlane.f32.xlu0 %v606_v32  ;;  %v643_v32 = vrot.slane %v642_v30, 2 }
 0x3c3   :  { %758 = vmax.xlane.f32.xlu0 %v757_v33 }
 0x3d9   :  { %s865_s22 = spop %864 }
 0x3da   :  { %s280_s23 = ssub.f32 %s865_s22, %s1073_s15  ;;  %s1114_s25 = spop %866 }
 0x3dc   :  { %s281_s24 = smul.f32 0.125, %s280_s23 }
 0x3dd   :  { %s869_s26 = spop %868 }
 0x3de   :  { %s1119_s27 = sadd.f32 %s281_s24, %s246_s21  ;;  %s871_s28 = spop %870 }
 0x3df   :  { %s391_s29 = ssub.f32 %s869_s26, %s1114_s25  ;;  %v401_v2 = vstv %s871_s28  ;;  %s981_s26 = smov [#allocation5]  }
 0x3e0   :  { %v402_v34 = vsub.f32 %v1050_v37, %v401_v2 }
 0x3e1   :  { %s1123_s30 = smul.f32 0.125, %s391_s29 }
 0x3e2   :  { %v403_v35 = vmul.f32 1.442695, %v402_v34 }
 0x3e3   :  { %s393_s2 = sadd.f32 %s1123_s30, %s1119_s27  ;;  %v524_v61 = vpop.xlane.xlu1 %523  ;;  %s791_s27 = sshll.u32 %s981_s26, 4  ;;  %s792_s27 = int_to_ptr.vmem [resolvable:$true] %s791_s27 }
 0x3e4   :  { %918 = vpow2.f32 %v403_v35  ;;  %v525_v63 = vrot.slane %v524_v61, 4  ;;  %s952_s29 = scalar_lea.vmem %s792_s27, 16  ;;  %s956_s30 = scalar_lea.vmem %s792_s27, 32 }
 0x3e5   :  { %p953_p5 = scmp.ne.s32.totalorder %s792_s27, %s952_s29  ;;  %p957_p6 = scmp.lt.s32.totalorder %s792_s27, %s792_s27 }
 0x3e6   :  { %v526_v4 = vadd.f32 %v525_v63, %v524_v61  ;;  %p958_p7 = scmp.lt.s32.totalorder %s956_s30, %s952_s29 }
 0x3e8   :  { %v527_v7 = vrot.slane %v526_v4, 2  ;;  %p959_p8 = por %p958_p7, %p957_p6 }
 0x3ea   :  { %v528_v14 = vadd.f32 %v527_v7, %v526_v4  ;;  %p960_p9 = pnand %p959_p8, %p953_p5 }
 0x3ec   :  { %v529_v19 = vrot.slane %v528_v14, 1 }
 0x3ee   :  { %v530_v24 = vadd.f32 %v529_v19, %v528_v14 }
 0x3f1   :  { %v919_v36 = vpop.eup %918 }
 0x3f2   :  { %v405_v38 = vmul.f32 %v919_v36, %v1056_v50 }
 0x3f4   :  { %v406_v39 = vsel %vm109_vm2, %v405_v38, 0.0 }
 0x3f5   :  { %v407_v40 = vrot.slane %v406_v39, 4 }
 0x3f7   :  { %v408_v41 = vadd.f32 %v407_v40, %v406_v39 }
 0x3f9   :  { %v409_v42 = vrot.slane %v408_v41, 2 }
 0x3fb   :  { %v410_v43 = vadd.f32 %v409_v42, %v408_v41 }
 0x3fd   :  { %v411_v44 = vrot.slane %v410_v43, 1 }
 0x3ff   :  { %v412_v45 = vadd.f32 %v411_v44, %v410_v43 }
 0x401   :  { %920 = vlog2.f32 %v412_v45 }
 0x40e   :  { %v921_v20 = vpop.eup %920 }
 0x40f   :  { %v414_v37 = vmul.f32 0.6931472, %v921_v20 }
 0x411   :  { %v415_v46 = vadd.f32 %v414_v37, %v401_v2  ;;  %v644_v2 = vmax.f32 %v642_v30, %v643_v32 }
 0x413   :  { %v416_v47 = vsel %vm269_vm4, %v415_v46, 0.0  ;;  %v645_v36 = vrot.slane %v644_v2, 1 }
 0x414   :  { %417 = vadd.xlane.f32.xlu1 %v416_v47 }
 0x415   :  { %v646_v40 = vmax.f32 %v644_v2, %v645_v36 }
 0x440   :  { %v624_v25 = vpop.xlane.xlu0 %623 }
 0x441   :  { %922 = vlog2.f32 %v624_v25 }
 0x444   :  { %v502_v48 = vpop.xlane.xlu0 %501 }
 0x445   :  { %v503_v62 = vrot.slane %v502_v48, 4 }
 0x447   :  { %v504_v1 = vadd.f32 %v503_v62, %v502_v48 }
 0x448   :  { %v608_v49 = vpop.xlane.xlu0 %607 }
 0x449   :  { %v609_v0 = vrot.slane %v608_v49, 4  ;;  %v505_v5 = vrot.slane %v504_v1, 2 }
 0x44b   :  { %v506_v11 = vadd.f32 %v505_v5, %v504_v1 }
 0x44c   :  { %v1130_v50 = vpop.xlane.xlu0 %758 }
 0x44d   :  { %v760_v52 = vsub.f32 %v1090_v51, %v1130_v50  ;;  %v610_v51 = vadd.f32 %v609_v0, %v608_v49  ;;  %v507_v17 = vrot.slane %v506_v11, 1 }
 0x44e   :  { %v923_v53 = vpop.eup %922 }
 0x44f   :  { %v626_v54 = vmul.f32 0.6931472, %v923_v53  ;;  %v761_v55 = vmul.f32 1.442695, %v760_v52  ;;  %v611_v9 = vrot.slane %v610_v51, 2  ;;  %v508_v23 = vadd.f32 %v507_v17, %v506_v11 }
 0x451   :  { %924 = vpow2.f32 %v761_v55  ;;  %v627_v56 = vadd.f32 %v626_v54, %v1097_v12  ;;  %v612_v15 = vadd.f32 %v611_v9, %v610_v51 }
 0x453   :  { %v628_v57 = vsel %vm122_vm3, %v627_v56, 0.0  ;;  %v613_v21 = vrot.slane %v612_v15, 1 }
 0x454   :  { %629 = vadd.xlane.f32.xlu1 %v628_v57 }
 0x455   :  { %v614_v26 = vadd.f32 %v613_v21, %v612_v15 }
 0x45e   :  { %v925_v59 = vpop.eup %924 }
 0x45f   :  { %v763_v60 = vsel %vm109_vm2, %v925_v59, 0.0 }
 0x460   :  { %764 = vadd.xlane.f32.xlu1 %v763_v60 }
 0x464   :  { %748 = vadd.xlane.f32.xlu1 %v747_v28 }
 0x49d   :  { %v418_v6 = vpop.xlane.xlu1 %417 }
 0x49e   :  { %v419_v8 = vrot.slane %v418_v6, 4 }
 0x4a0   :  { %v420_v10 = vadd.f32 %v419_v8, %v418_v6 }
 0x4a2   :  { %v421_v13 = vrot.slane %v420_v10, 2 }
 0x4a4   :  { %v422_v16 = vadd.f32 %v421_v13, %v420_v10 }
 0x4a6   :  { %v423_v18 = vrot.slane %v422_v16, 1 }
 0x4a8   :  { %v424_v22 = vadd.f32 %v423_v18, %v422_v16 }
 0x4aa   :  { %872 = vpush %v424_v22 }
 0x4ab   :  { %874 = vpush %v508_v23 }
 0x4ac   :  { %876 = vpush %v530_v24 }
 0x4ad   :  { %878 = vpush %v614_v26 }
 0x4db   :  { %s873_s3 = spop %872 }
 0x4dc   :  { %s426_s4 = ssub.f32 %s873_s3, %s1114_s25  ;;  %s875_s5 = spop %874 }
 0x4dd   :  { %s877_s6 = spop %876  ;;  %v630_v31 = vpop.xlane.xlu1 %629 }
 0x4de   :  { %s427_s7 = smul.f32 0.125, %s426_s4  ;;  %s532_s8 = ssub.f32 %s877_s6, %s875_s5  ;;  %v631_v33 = vrot.slane %v630_v31, 4 }
 0x4df   :  { %s1146_s12 = spop %878 }
 0x4e0   :  { %s428_s9 = sadd.f32 %s427_s7, %s393_s2  ;;  %s533_s10 = smul.f32 0.125, %s532_s8  ;;  %v632_v3 = vadd.f32 %v631_v33, %v630_v31 }
 0x4e2   :  { %s534_s11 = sadd.f32 %s533_s10, %s428_s9  ;;  %v633_v34 = vrot.slane %v632_v3, 2 }
 0x4e4   :  { %v634_v35 = vadd.f32 %v633_v34, %v632_v3 }
 0x4e6   :  { %v635_v38 = vrot.slane %v634_v35, 1 }
 0x4e8   :  { %v636_v39 = vadd.f32 %v635_v38, %v634_v35 }
 0x4e9   :  { %v765_v48 = vpop.xlane.xlu1 %764 }
 0x4ea   :  { %880 = vpush %v636_v39 }
 0x4eb   :  { %882 = vpush %v646_v40 }
 0x4ed   :  { %v749_v60 = vpop.xlane.xlu1 %748 }
 0x4ee   :  { %v750_v61 = vrot.slane %v749_v60, 4 }
 0x4f0   :  { %v751_v62 = vadd.f32 %v750_v61, %v749_v60 }
 0x4f2   :  { %v752_v63 = vrot.slane %v751_v62, 2 }
 0x4f4   :  { %v753_v51 = vadd.f32 %v752_v63, %v751_v62 }
 0x4f6   :  { %v754_v10 = vrot.slane %v753_v51, 1 }
 0x4f8   :  { %v755_v15 = vadd.f32 %v754_v10, %v753_v51 }
 0x51b   :  { %s881_s0 = spop %880 }
 0x51c   :  { %s638_s13 = ssub.f32 %s881_s0, %s1146_s12  ;;  %s883_s14 = spop %882 }
 0x51d   :  { %v648_v41 = vstv %s883_s14 }
 0x51e   :  { %s639_s15 = smul.f32 0.125, %s638_s13  ;;  %v649_v42 = vsub.f32 %v1097_v12, %v648_v41 }
 0x520   :  { %s1150_s16 = sadd.f32 %s639_s15, %s534_s11  ;;  %v650_v43 = vmul.f32 1.442695, %v649_v42 }
 0x522   :  { %926 = vpow2.f32 %v650_v43 }
 0x523   :  { %928 = vlog2.f32 %v765_v48 }
 0x52f   :  { %v927_v44 = vpop.eup %926 }
 0x530   :  { %v652_v45 = vmul.f32 %v927_v44, %v1103_v58  ;;  %v929_v53 = vpop.eup %928 }
 0x531   :  { %v767_v54 = vmul.f32 0.6931472, %v929_v53 }
 0x532   :  { %v653_v20 = vsel %vm109_vm2, %v652_v45, 0.0 }
 0x533   :  { %v654_v37 = vrot.slane %v653_v20, 4  ;;  %v768_v58 = vadd.f32 %v767_v54, %v1130_v50 }
 0x535   :  { %v655_v46 = vadd.f32 %v654_v37, %v653_v20  ;;  %v769_v59 = vsel %vm122_vm3, %v768_v58, 0.0 }
 0x537   :  { %v656_v47 = vrot.slane %v655_v46, 2 }
 0x539   :  { %v657_v25 = vadd.f32 %v656_v47, %v655_v46 }
 0x53b   :  { %v658_v49 = vrot.slane %v657_v25, 1 }
 0x53d   :  { %v659_v52 = vadd.f32 %v658_v49, %v657_v25 }
 0x53f   :  { %930 = vlog2.f32 %v659_v52 }
 0x54c   :  { %v931_v12 = vpop.eup %930 }
 0x54d   :  { %v661_v55 = vmul.f32 0.6931472, %v931_v12 }
 0x54f   :  { %v662_v56 = vadd.f32 %v661_v55, %v648_v41 }
 0x551   :  { %v663_v57 = vsel %vm269_vm4, %v662_v56, 0.0 }
 0x552   :  { %664 = vadd.xlane.f32.xlu0 %v663_v57 }
 0x556   :  { %770 = vadd.xlane.f32.xlu0 %v769_v59 }
 0x5db   :  { %v665_v0 = vpop.xlane.xlu0 %664 }
 0x5dc   :  { %v666_v1 = vrot.slane %v665_v0, 4 }
 0x5de   :  { %v667_v4 = vadd.f32 %v666_v1, %v665_v0 }
 0x5df   :  { %v771_v5 = vpop.xlane.xlu0 %770 }
 0x5e0   :  { %v668_v6 = vrot.slane %v667_v4, 2  ;;  %v772_v7 = vrot.slane %v771_v5, 4 }
 0x5e2   :  { %v773_v8 = vadd.f32 %v772_v7, %v771_v5  ;;  %v669_v9 = vadd.f32 %v668_v6, %v667_v4 }
 0x5e4   :  { %v774_v50 = vrot.slane %v773_v8, 2  ;;  %v670_v11 = vrot.slane %v669_v9, 1 }
 0x5e6   :  { %v775_v13 = vadd.f32 %v774_v50, %v773_v8  ;;  %v671_v14 = vadd.f32 %v670_v11, %v669_v9 }
 0x5e8   :  { %884 = vpush %v671_v14  ;;  %v776_v16 = vrot.slane %v775_v13, 1 }
 0x5e9   :  { %886 = vpush %v755_v15 }
 0x5ea   :  { %v777_v17 = vadd.f32 %v776_v16, %v775_v13 }
 0x5ec   :  { %888 = vpush %v777_v17 }
 0x619   :  { %s885_s17 = spop %884 }
 0x61a   :  { %s673_s18 = ssub.f32 %s885_s17, %s1146_s12  ;;  %s887_s19 = spop %886 }
 0x61c   :  { %s674_s20 = smul.f32 0.125, %s673_s18 }
 0x61d   :  { %s889_s21 = spop %888 }
 0x61e   :  { %s779_s22 = ssub.f32 %s889_s21, %s887_s19 }
 0x61f   :  { %s675_s23 = sadd.f32 %s674_s20, %s1150_s16 }
 0x620   :  { %s780_s24 = smul.f32 0.125, %s779_s22 }
 0x622   :  { %s781_s25 = sadd.f32 %s780_s24, %s675_s23 }
 0x624   :  { %s782_s28 = smul.f32 0.16666667, %s781_s25 }
 0x626   :  { %v783_v18 = vstv %s782_s28 }
 0x627   :  { %784 = vst [vmem:[#allocation5] sm:$0x1] %v783_v18 }
 0x628   :  { %963 = shalt.err (!%p960_p9)
}
 0x629   :  { %794 = dma.vmem_to_hbm [thread:$0]  %s792_s27, 16, %s1163_s1, [#allocation4]  }
 0x62a   :  { %974 = dma.done.wait [#allocation4], 16  }
 0x62b   :  { %975 = vsyncadd [#allocation4], 4294967280 }
 0x62c   :  { %798 = vsyncpa [#allocation3], 1 }
 0x62d   :  { %799 = vsyncpa [#allocation4], 1 }

</bundles_post_ra>
